<compile_context>
chip_gen: v7x
topology: tpu7x:2x2x1
jax: 0.10.0
libtpu: 0.0.40
codegen_flags: <defaults>
</compile_context>

<pallas_src>
import jax
import jax.numpy as jnp
from jax.experimental import pallas as pl
from jax.experimental.pallas import tpu as pltpu

# small, module-consistent shapes
B = 2        # batch
D_DIM = 128  # descriptor / channel dim (lane-dense)
IMG = 16     # H = W  -> N = 256 spatial locations
K_CLU = 16   # number of clusters
ALPHA = 1.0

_EPS_SQ = 1e-24  # F.normalize clamps the *norm* at 1e-12 -> clamp the squared sum at 1e-24


def _netvlad_kernel(x_ref, w_ref, c_ref, b_ref, o_ref):
    # x_ref : [D, N]  one batch element, channel-major (free reshape of NCHW)
    # w_ref : [K, D]  2*alpha*C      (1x1-conv weight), bf16
    # c_ref : [K, D]  C                                  f32
    # b_ref : [K, 1]  -alpha*||C||_2 (1x1-conv bias),    f32
    # o_ref : [K, D]  V  (lane-dense output block, no wrapper transpose)
    x = x_ref[...].astype(jnp.float32)                                    # [D, N]

    # input L2 normalization over the descriptor dim D (F.normalize(p=2, dim=1))
    xn = x * jax.lax.rsqrt(jnp.maximum(jnp.sum(x * x, axis=0, keepdims=True), _EPS_SQ))
    xn_b = xn.astype(jnp.bfloat16)                                        # MXU operand

    # soft assignment, computed transposed: S^T [K, N]
    #   logits^T = W @ xn : lhs [K,D] contracts its last dim, rhs [D,N] its
    #   first -> both natural MXU layouts; bf16 in, f32 accumulate.
    logits = jnp.dot(w_ref[...], xn_b, preferred_element_type=jnp.float32) + b_ref[...]
    # softmax over clusters K = axis 0 (sublane reduce on a lane-dense [16,N]
    # block).  Max-subtraction dropped: |logits| <= 3*alpha*max_k||c_k|| here,
    # well inside f32 exp range.  Exact (non-approx) denominator per review.
    e = jnp.exp(logits)
    s = e / jnp.sum(e, axis=0, keepdims=True)                             # [K, N] f32

    # residual aggregation, directly in the output layout:
    #   V[k, d] = sum_n S^T[k, n] * xn[d, n]  -  C[k, d] * (sum_n S^T[k, n])
    v = jax.lax.dot_general(s.astype(jnp.bfloat16), xn_b,
                            (((1,), (1,)), ((), ())),
                            preferred_element_type=jnp.float32)           # [K, D]
    ssum = jnp.sum(s, axis=1, keepdims=True)                              # [K, 1]
    v = v - c_ref[...] * ssum

    # F.normalize over clusters (module dim=0), then over descriptors (dim=1)
    v = v * jax.lax.rsqrt(jnp.maximum(jnp.sum(v * v, axis=0, keepdims=True), _EPS_SQ))
    v = v * jax.lax.rsqrt(jnp.maximum(jnp.sum(v * v, axis=1, keepdims=True), _EPS_SQ))
    o_ref[...] = v


def netvlad_forward(x_nchw, c_clusters, alpha=ALPHA):
    """NetVLAD.forward: [B, D, H, W] -> [B, K, D] in one fused pallas_call."""
    b, d, h, w = x_nchw.shape
    n = h * w
    k = c_clusters.shape[0]

    # Free reshape (H, W contiguous): no HBM relayout and no dtype cast -- a
    # bf16 upstream activation would flow straight into the kernel DMA.
    x_bdn = x_nchw.reshape(b, d, n)

    # conv parameters exactly as derived in NetVLAD.__init__ (tiny, host-side)
    c32 = c_clusters.astype(jnp.float32)                                    # [K, D]
    w_cl = (2.0 * alpha * c32).astype(jnp.bfloat16)                         # [K, D]
    b_cl = (-alpha * jnp.sqrt(jnp.sum(c32 * c32, axis=1)))[:, None]         # [K, 1]

    return pl.pallas_call(
        _netvlad_kernel,
        out_shape=jax.ShapeDtypeStruct((b, k, d), jnp.float32),
        grid=(b,),
        in_specs=[
            pl.BlockSpec((None, d, n), lambda i: (i, 0, 0)),   # per-batch x [D, N]
            pl.BlockSpec((k, d), lambda i: (0, 0)),            # conv weight (bf16)
            pl.BlockSpec((k, d), lambda i: (0, 0)),            # C
            pl.BlockSpec((k, 1), lambda i: (0, 0)),            # conv bias column
        ],
        out_specs=pl.BlockSpec((None, k, d), lambda i: (i, 0, 0)),  # lane-dense V
        # "parallel": v7x shards the B=2 grid across its two TensorCores;
        # harmless no-op on single-TC v5e/v6e.
        compiler_params=pltpu.CompilerParams(dimension_semantics=("parallel",)),
    )(x_bdn, w_cl, c32, b_cl)


def _netvlad_ref(x_nchw, c, alpha=ALPHA):
    """Pure-JAX transcription of the PyTorch forward (verification only)."""
    b, d, h, w = x_nchw.shape
    xf = jnp.transpose(x_nchw, (0, 2, 3, 1)).reshape(b, -1, d).astype(jnp.float32)
    xf = xf / jnp.maximum(jnp.linalg.norm(xf, axis=-1, keepdims=True), 1e-12)
    c = c.astype(jnp.float32)
    logits = (jnp.einsum("bnd,kd->bnk", xf, 2.0 * alpha * c)
              - alpha * jnp.linalg.norm(c, axis=1))
    s = jax.nn.softmax(logits, axis=-1)
    v = jnp.einsum("bnk,bnd->bkd", s, xf) - c[None] * jnp.sum(s, axis=1)[..., None]
    v = v / jnp.maximum(jnp.linalg.norm(v, axis=1, keepdims=True), 1e-12)  # over K (dim=0)
    v = v / jnp.maximum(jnp.linalg.norm(v, axis=2, keepdims=True), 1e-12)  # over D (dim=1)
    return v


if __name__ == "__main__":
    key = jax.random.PRNGKey(0)
    k_x, k_c = jax.random.split(key)
    x = jax.random.normal(k_x, (B, D_DIM, IMG, IMG), dtype=jnp.float32)
    c_clusters = jax.random.uniform(k_c, (K_CLU, D_DIM), dtype=jnp.float32)  # torch.rand(K, D)

    out = jax.block_until_ready(netvlad_forward(x, c_clusters))

    assert out.shape == (B, K_CLU, D_DIM)
    assert bool(jnp.all(jnp.isfinite(out)))
    ref = _netvlad_ref(x, c_clusters)
    max_err = float(jnp.max(jnp.abs(out - ref)))
    assert max_err < 5e-3, max_err  # bf16-matmul-operand tolerance (f32 accumulate)
    print("KERNEL_OK")
</pallas_src>

<mosaic_0001>
module attributes {stable_mosaic.version = 11 : i64} {
  func.func @_netvlad_kernel(%arg0: i32, %arg1: memref<1x128x256xf32, #tpu.memory_space<vmem>>, %arg2: memref<16x128xbf16, #tpu.memory_space<vmem>>, %arg3: memref<16x128xf32, #tpu.memory_space<vmem>>, %arg4: memref<16x1xf32, #tpu.memory_space<vmem>>, %arg5: memref<1x16x128xf32, #tpu.memory_space<vmem>>) attributes {dimension_semantics = [#tpu.dimension_semantics<parallel>], iteration_bounds = array<i64: 2>, scalar_prefetch = 0 : i64, scratch_operands = 0 : i64, tpu.core_type = #tpu.core_type<tc>, window_params = [{transform_indices = @transform_0, window_bounds = array<i64: 1, 128, 256>}, {pipeline_mode = #tpu.pipeline_mode<synchronous>, transform_indices = @transform_1, window_bounds = array<i64: 16, 128>}, {pipeline_mode = #tpu.pipeline_mode<synchronous>, transform_indices = @transform_2, window_bounds = array<i64: 16, 128>}, {pipeline_mode = #tpu.pipeline_mode<synchronous>, transform_indices = @transform_3, window_bounds = array<i64: 16, 1>}, {transform_indices = @transform_4, window_bounds = array<i64: 1, 16, 128>}]} {
    %c0 = arith.constant 0 : index
    %c0_0 = arith.constant 0 : index
    %c0_1 = arith.constant 0 : index
    %0 = vector.load %arg1[%c0, %c0_0, %c0_1] : memref<1x128x256xf32, #tpu.memory_space<vmem>>, vector<1x128x256xf32>
    %1 = vector.shape_cast %0 : vector<1x128x256xf32> to vector<128x256xf32>
    %2 = arith.mulf %1, %1 : vector<128x256xf32>
    %cst = arith.constant dense<0.000000e+00> : vector<256xf32>
    %3 = vector.multi_reduction <add>, %2, %cst [0] : vector<128x256xf32> to vector<256xf32>
    %4 = vector.shape_cast %3 : vector<256xf32> to vector<1x256xf32>
    %cst_2 = arith.constant 1.000000e-24 : f32
    %5 = vector.broadcast %cst_2 : f32 to vector<1x256xf32>
    %6 = arith.maximumf %4, %5 : vector<1x256xf32>
    %7 = math.rsqrt %6 : vector<1x256xf32>
    %8 = vector.broadcast %7 : vector<1x256xf32> to vector<128x256xf32>
    %9 = arith.mulf %1, %8 : vector<128x256xf32>
    %10 = arith.truncf %9 : vector<128x256xf32> to vector<128x256xbf16>
    %c0_3 = arith.constant 0 : index
    %c0_4 = arith.constant 0 : index
    %11 = vector.load %arg2[%c0_3, %c0_4] : memref<16x128xbf16, #tpu.memory_space<vmem>>, vector<16x128xbf16>
    %cst_5 = arith.constant dense<0.000000e+00> : vector<16x256xf32>
    %12 = tpu.matmul %11, %10, %cst_5 {dimension_numbers = #tpu.dot_dimension_numbers<[1], [0], [0], [1], [0, 0, 1, 1], [], []>} : vector<16x128xbf16>, vector<128x256xbf16>, vector<16x256xf32> -> vector<16x256xf32>
    %c0_6 = arith.constant 0 : index
    %c0_7 = arith.constant 0 : index
    %13 = vector.load %arg4[%c0_6, %c0_7] : memref<16x1xf32, #tpu.memory_space<vmem>>, vector<16x1xf32>
    %14 = vector.broadcast %13 : vector<16x1xf32> to vector<16x256xf32>
    %15 = arith.addf %12, %14 : vector<16x256xf32>
    %16 = math.exp %15 : vector<16x256xf32>
    %cst_8 = arith.constant dense<0.000000e+00> : vector<256xf32>
    %17 = vector.multi_reduction <add>, %16, %cst_8 [0] : vector<16x256xf32> to vector<256xf32>
    %18 = vector.shape_cast %17 : vector<256xf32> to vector<1x256xf32>
    %19 = vector.broadcast %18 : vector<1x256xf32> to vector<16x256xf32>
    %20 = arith.divf %16, %19 : vector<16x256xf32>
    %21 = arith.truncf %20 : vector<16x256xf32> to vector<16x256xbf16>
    %cst_9 = arith.constant dense<0.000000e+00> : vector<16x128xf32>
    %22 = tpu.matmul %21, %10, %cst_9 {dimension_numbers = #tpu.dot_dimension_numbers<[1], [1], [0], [0], [0, 0, 1, 0], [], []>} : vector<16x256xbf16>, vector<128x256xbf16>, vector<16x128xf32> -> vector<16x128xf32>
    %cst_10 = arith.constant dense<0.000000e+00> : vector<16xf32>
    %23 = vector.multi_reduction <add>, %20, %cst_10 [1] : vector<16x256xf32> to vector<16xf32>
    %24 = vector.shape_cast %23 : vector<16xf32> to vector<16x1xf32>
    %c0_11 = arith.constant 0 : index
    %c0_12 = arith.constant 0 : index
    %25 = vector.load %arg3[%c0_11, %c0_12] : memref<16x128xf32, #tpu.memory_space<vmem>>, vector<16x128xf32>
    %26 = vector.broadcast %24 : vector<16x1xf32> to vector<16x128xf32>
    %27 = arith.mulf %25, %26 : vector<16x128xf32>
    %28 = arith.subf %22, %27 : vector<16x128xf32>
    %29 = arith.mulf %28, %28 : vector<16x128xf32>
    %cst_13 = arith.constant dense<0.000000e+00> : vector<128xf32>
    %30 = vector.multi_reduction <add>, %29, %cst_13 [0] : vector<16x128xf32> to vector<128xf32>
    %31 = vector.shape_cast %30 : vector<128xf32> to vector<1x128xf32>
    %cst_14 = arith.constant 1.000000e-24 : f32
    %32 = vector.broadcast %cst_14 : f32 to vector<1x128xf32>
    %33 = arith.maximumf %31, %32 : vector<1x128xf32>
    %34 = math.rsqrt %33 : vector<1x128xf32>
    %35 = vector.broadcast %34 : vector<1x128xf32> to vector<16x128xf32>
    %36 = arith.mulf %28, %35 : vector<16x128xf32>
    %37 = arith.mulf %36, %36 : vector<16x128xf32>
    %cst_15 = arith.constant dense<0.000000e+00> : vector<16xf32>
    %38 = vector.multi_reduction <add>, %37, %cst_15 [1] : vector<16x128xf32> to vector<16xf32>
    %39 = vector.shape_cast %38 : vector<16xf32> to vector<16x1xf32>
    %cst_16 = arith.constant 1.000000e-24 : f32
    %40 = vector.broadcast %cst_16 : f32 to vector<16x1xf32>
    %41 = arith.maximumf %39, %40 : vector<16x1xf32>
    %42 = math.rsqrt %41 : vector<16x1xf32>
    %43 = vector.broadcast %42 : vector<16x1xf32> to vector<16x128xf32>
    %44 = arith.mulf %36, %43 : vector<16x128xf32>
    %c0_17 = arith.constant 0 : index
    %c0_18 = arith.constant 0 : index
    %c0_19 = arith.constant 0 : index
    %45 = vector.load %arg5[%c0_17, %c0_18, %c0_19] : memref<1x16x128xf32, #tpu.memory_space<vmem>>, vector<1x16x128xf32>
    %46 = vector.shape_cast %45 : vector<1x16x128xf32> to vector<16x128xf32>
    %47 = vector.shape_cast %44 : vector<16x128xf32> to vector<1x16x128xf32>
    tpu.vector_store %arg5[%c0_17, %c0_18, %c0_19], %47 {strides = array<i32>} : memref<1x16x128xf32, #tpu.memory_space<vmem>>, vector<1x16x128xf32>,
    return
  }
  func.func @transform_0(%arg0: i32) -> (i32, i32, i32) {
    %c0_i32 = arith.constant 0 : i32
    %c0_i32_0 = arith.constant 0 : i32
    %c0_i32_1 = arith.constant 0 : i32
    return %arg0, %c0_i32, %c0_i32_0 : i32, i32, i32
  }
  func.func @transform_1(%arg0: i32) -> (i32, i32) {
    %c0_i32 = arith.constant 0 : i32
    %c0_i32_0 = arith.constant 0 : i32
    %c0_i32_1 = arith.constant 0 : i32
    return %c0_i32, %c0_i32_0 : i32, i32
  }
  func.func @transform_2(%arg0: i32) -> (i32, i32) {
    %c0_i32 = arith.constant 0 : i32
    %c0_i32_0 = arith.constant 0 : i32
    %c0_i32_1 = arith.constant 0 : i32
    return %c0_i32, %c0_i32_0 : i32, i32
  }
  func.func @transform_3(%arg0: i32) -> (i32, i32) {
    %c0_i32 = arith.constant 0 : i32
    %c0_i32_0 = arith.constant 0 : i32
    %c0_i32_1 = arith.constant 0 : i32
    return %c0_i32, %c0_i32_0 : i32, i32
  }
  func.func @transform_4(%arg0: i32) -> (i32, i32, i32) {
    %c0_i32 = arith.constant 0 : i32
    %c0_i32_0 = arith.constant 0 : i32
    %c0_i32_1 = arith.constant 0 : i32
    return %arg0, %c0_i32, %c0_i32_0 : i32, i32, i32
  }
}

</mosaic_0001>

<bundles_post_ra>
// kernel: tpu_custom_call.1
= control target key start
LH: loop header
LB: loop body
LE: loop exit
PB: predicated region body
PF: predicated region fallthrough
CT: control target
= control target key end

     0   :  { %9 = vsyncpa [#allocation3], 0  ;;  %s1229_s0 = inlined_call_operand.hbm [shape: f32[2,128,256], index: 0, kind: input, shape index: {}]   ;;  %s1230_s1 = inlined_call_operand.vmem [shape: bf16[16,128], index: 1, kind: input, shape index: {}]   ;;  %s1231_s2 = inlined_call_operand.vmem [shape: f32[16,128], index: 2, kind: input, shape index: {}]   ;;  %s1232_s3 = inlined_call_operand.vmem [shape: f32[16,1], index: 3, kind: input, shape index: {}]   ;;  %s1233_s4 = inlined_call_operand.hbm [shape: f32[2,16,128], index: 4, kind: output, shape index: {}]  }
   0x1   :  { %11 = vsyncpa [#allocation3 + $0x1], 0 }
   0x2   :  { %12 = vsyncpa [#allocation4], 0 }
   0x3   :  { %14 = vsyncpa [#allocation4 + $0x1], 0  ;;  %s857_s15 = smov 0   ;;  %s859_s16 = smov 0  }
   0x4   :  { %s861_s17 = smov 0   ;;  %s863_s18 = smov 0  }
   0x5 LB: > { %s878_s19 = sadd.s32 4294967295, %s823_s18   ;;  %s635_s20 = sadd.s32 4294967294, %s823_s18   ;;  %s823_s18 = sphi %s863_s18, %s1246_s18   ;;  %s819_s17 = sphi %s861_s17, %s1245_s17   ;;  %s815_s16 = sphi %s859_s16, %s1244_s16   ;;  %s811_s15 = sphi %s857_s15, %s1243_s15  }
   0x6   : > { %s882_s21 = sadd.s32 1, %s823_s18   ;;  %s27_s22 = sadd.s32 1, %s819_s17 }
   0x7   : > { %s24_s23 = ssub.s32 %s823_s18, %s882_s21  ;;  %p34_p0 = scmp.ne.s32.totalorder %s819_s17, %s815_s16 }
   0x8   : > { %p25_p1 = scmp.eq.s32.totalorder %s24_s23, 0  ;;  %p35_p2 = scmp.eq.s32.totalorder %s823_s18, 0 }
   0x9   : > { %p40_p3 = scmp.ne.s32.totalorder %s815_s16, %s811_s15  ;;  %p41_p4 = scmp.eq.s32.totalorder %s878_s19, 0 }
   0xa   : > { %s894_s24 = scalar_select %p25_p1, %s819_s17, %s27_s22  }
   0xb   : > { %p896_p5 = por %p35_p2, %p34_p0  ;;  %p900_p6 = por %p41_p4, %p40_p3 }
   0xc   : > { %p127_p7 = scmp.eq.s32.totalorder %s878_s19, 1  ;;  %p133_p8 = scmp.eq.s32.totalorder %s635_s20, 1 }
   0xd   : > { %p664_p10 = scmp.lt.s32.totalorder %s823_s18, 2  ;;  %s162_s29 = sand.u32 1, %s819_s17  }
   0xe   : > { %p907_p11 = por %p127_p7, %p34_p0  ;;  %p911_p12 = por %p133_p8, %p40_p3 }
   0xf   : > { %s650_s30 = sshll.u32 %s823_s18, 12  ;;  %s638_s5 = sshll.u32 %s162_s29, 8 }
  0x10   : > { %s1237_s27 = scalar_select %p907_p11, 1, 0 }
  0x11   : > { %s1238_s28 = scalar_select %p911_p12, 1, 0 }
  0x12   : > { %s920_s8 = scalar_lea.hbm %s1229_s0, %s650_s30  ;;  %s166_s9 = scalar_lea.vmem [#allocation2], %s638_s5 }
  0x13   : > { %s173_s10 = sshll.u32 %s166_s9, 4  ;;  %p924_p13 = pnand %p664_p10, %p896_p5  ;;  %s928_s10 = int_to_ptr.vmem [resolvable:$true] %s173_s10 }
  0x14   : > { %s930_s12 = scalar_lea.sflag [#allocation3], %s162_s29  ;;  %s727_s13 = scalar_lea.hbm %s920_s8, 4096 }
  0x15   : > { %p728_p0 = scmp.ne.s32.totalorder %s920_s8, %s727_s13  ;;  %p729_p1 = pneg %p924_p13 }
  0x16   : > { %s732_s22 = scalar_lea.hbm %s1229_s0, 8192  ;;  %p733_p4 = scmp.lt.u32.totalorder %s920_s8, %s1229_s0 }
  0x17   : > { %p730_p2 = pnand %p729_p1, %p728_p0  ;;  %p734_p5 = scmp.lt.u32.totalorder %s732_s22, %s727_s13 }
  0x18   : > { %p736_p8 = scmp.lt.u32.totalorder %s727_s13, %s920_s8 }
  0x19   : > { %p731_p3 = pneg %p730_p2  ;;  %p735_p7 = por %p734_p5, %p733_p4 }
  0x1b   : > { %p737_p10 = por %p736_p8, %p735_p7 }
  0x1d   : > { %p738_p9 = pnand %p737_p10, %p731_p3 }
  0x1f   : > { %741 = shalt.err (!%p738_p9)
}
  0x20   : > { %s742_s29 = scalar_lea.vmem %s928_s10, 4096  ;;  %s825_s30 = smov [#allocation2]  }
  0x21   : > { %p743_p0 = scmp.ne.s32.totalorder %s928_s10, %s742_s29  ;;  %s747_s5 = sshll.u32 %s825_s30, 4  ;;  %s748_s5 = int_to_ptr.vmem [resolvable:$false] %s747_s5 }
  0x22   : > { %s749_s6 = scalar_lea.vmem %s748_s5, 8192  ;;  %p750_p11 = scmp.lt.s32.totalorder %s928_s10, %s748_s5 }
  0x23   : > { %p745_p2 = pnand %p743_p0, %p729_p1  ;;  %p751_p4 = scmp.lt.s32.totalorder %s749_s6, %s742_s29 }
  0x25   : > { %p746_p12 = pneg %p745_p2  ;;  %p752_p5 = por %p751_p4, %p750_p11 }
  0x27   : > { %p753_p7 = pnand %p752_p5, %p746_p12 }
  0x29   : > { %756 = shalt.err (!%p753_p7)
}
  0x2a   : > { %s826_s7 = smov 256   ;;  %s827_s9 = smov 16  }
  0x2b   : > { %659 = dma.hbm_to_vmem [thread:$0]  (!%p924_p13), %s920_s8, 4096, %s928_s10, %s930_s12, %s826_s7, %s826_s7, %s827_s9  }
  0x2c   : > { %p641_p9 = scmp.ge.s32.totalorder %s823_s18, 1  ;;  %p181_p1 = scmp.lt.s32.totalorder %s823_s18, 3 }
  0x2e   : > { %p182_p3 = pnand %p641_p9, %p181_p1 }
  0x2f   : > { %s961_s13 = sand.u32 (!%p182_p3), 1, %s815_s16  }
  0x30   : > { %185 = sbr.rel (%p182_p3) target bundleno = 833 (0x341), region = 36  ;;  %s642_s14 = sshll.u32 (!%p182_p3), %s961_s13, 8 }
  0x31   : > { %s188_s20 = scalar_lea.sflag (!%p182_p3), [#allocation3], %s961_s13  ;;  %s965_s22 = scalar_lea.vmem (!%p182_p3), [#allocation2], %s642_s14 }
  0x37   : > { %802 = dma.done.wait (%p900_p6), %s188_s20, 4096  }
  0x38   : > { %804 = vsyncadd (%p900_p6), %s188_s20, 4294963200  ;;  %v828_v0 = vmov 0   ;;  %v972_v1 = vld [vmem:[%s965_s22 + $0x8] sm:$0xff]  ;;  %v975_v2 = vld [vmem:[%s965_s22 + $0x18] sm:$0xff]  ;;  %s643_s6 = sshll.u32 %s961_s13, 4  ;;  %s651_s7 = sshll.u32 %s878_s19, 8 }
  0x39   : > { %427 = vmatprep.mubr.bf16.mxu0 %v828_v0  ;;  %703 = vset.pattern.permute.xlu0 %v828_v0  ;;  %v978_v3 = vld [vmem:[%s965_s22 + $0x28] sm:$0xff]  ;;  %v981_v4 = vld [vmem:[%s965_s22 + $0x38] sm:$0xff]  ;;  %v250_v5 = vmul.f32 %v972_v1, %v972_v1  ;;  %v252_v6 = vmul.f32 %v975_v2, %v975_v2  ;;  %v1000_v14 = vld [vmem:[%s965_s22] sm:$0xff]  ;;  %s215_s9 = scalar_lea.vmem [#allocation5], %s643_s6  ;;  %s1183_s26 = scalar_lea.hbm %s1233_s4, %s651_s7 }
  0x3a   : > { %v254_v7 = vmul.f32 %v978_v3, %v978_v3  ;;  %v990_v8 = vld [vmem:[%s965_s22 + $0x48] sm:$0xff]  ;;  %v256_v9 = vmul.f32 %v981_v4, %v981_v4  ;;  %v995_v11 = vld [vmem:[%s965_s22 + $0x58] sm:$0xff]  ;;  %v1003_v15 = vld [vmem:[%s965_s22 + $0x10] sm:$0xff]  ;;  %v249_v19 = vmul.f32 %v1000_v14, %v1000_v14  ;;  %s562_s14 = sshll.u32 %s215_s9, 4  ;;  %s549_s8 = scalar_lea.sflag [#allocation4], %s961_s13  ;;  %s1185_s14 = int_to_ptr.vmem [resolvable:$true] %s562_s14 }
  0x3b   : > { %v302_v10 = vadd.f32 %v252_v6, %v250_v5  ;;  %v258_v12 = vmul.f32 %v990_v8, %v990_v8  ;;  %v1006_v16 = vld [vmem:[%s965_s22 + $0x68] sm:$0xff]  ;;  %v1009_v17 = vld [vmem:[%s965_s22 + $0x20] sm:$0xff]  ;;  %v1012_v18 = vld [vmem:[%s965_s22 + $0x30] sm:$0xff]  ;;  %v251_v20 = vmul.f32 %v1003_v15, %v1003_v15  ;;  %v260_v21 = vmul.f32 %v995_v11, %v995_v11  ;;  %s757_s19 = scalar_lea.vmem %s1185_s14, 256  ;;  %p1240_p11 = scmp.ne.s32.totalorder %s1237_s27, 0 }
  0x3c   : > { %v1021_v23 = vld [vmem:[%s965_s22 + $0x40] sm:$0xff]  ;;  %v253_v24 = vmul.f32 %v1009_v17, %v1009_v17  ;;  %v1026_v25 = vld [vmem:[%s965_s22 + $0x78] sm:$0xff]  ;;  %v255_v26 = vmul.f32 %v1012_v18, %v1012_v18  ;;  %v262_v28 = vmul.f32 %v1006_v16, %v1006_v16  ;;  %v1033_v30 = vld [vmem:[%s965_s22 + $0x50] sm:$0xff]  ;;  %p758_p6 = scmp.ne.s32.totalorder %s1185_s14, %s757_s19  ;;  %s829_s10 = smov [#allocation5]  }
  0x3d   : > { %v303_v13 = vadd.f32 %v302_v10, %v254_v7  ;;  %v281_v27 = vadd.f32 %v251_v20, %v249_v19  ;;  %v1036_v31 = vld [vmem:[%s965_s22 + $0x88] sm:$0xff]  ;;  %v257_v32 = vmul.f32 %v1021_v23, %v1021_v23  ;;  %v264_v34 = vmul.f32 %v1026_v25, %v1026_v25  ;;  %v1043_v36 = vld [vmem:[%s965_s22 + $0x60] sm:$0xff]  ;;  %v1049_v38 = vld [vmem:[%s965_s22 + $0x98] sm:$0xff]  ;;  %s761_s11 = sshll.u32 %s829_s10, 4  ;;  %s762_s11 = int_to_ptr.vmem [resolvable:$false] %s761_s11 }
  0x3e   : > { %v377_v37 = vld [vmem:[%s1232_s3] sm:$0xff]  ;;  %v259_v39 = vmul.f32 %v1033_v30, %v1033_v30  ;;  %v266_v41 = vmul.f32 %v1036_v31, %v1036_v31  ;;  %v1056_v43 = vld [vmem:[%s965_s22 + $0x70] sm:$0xff]  ;;  %v378_v44 = vld [vmem:[%s1232_s3 + $0x8] sm:$0xff]  ;;  %v261_v46 = vmul.f32 %v1043_v36, %v1043_v36  ;;  %v268_v48 = vmul.f32 %v1049_v38, %v1049_v38  ;;  %p759_p12 = pnand %p758_p6, %p1240_p11  ;;  %s763_s12 = scalar_lea.vmem %s762_s11, 512 }
  0x3f   : > { %v304_v22 = vadd.f32 %v303_v13, %v256_v9  ;;  %v282_v33 = vadd.f32 %v281_v27, %v253_v24  ;;  %381 = vperm.xlu0 %703, %v377_v37   ;;  %v1062_v45 = vld [vmem:[%s965_s22 + $0xa8] sm:$0xff]  ;;  %v1069_v50 = vld [vmem:[%s965_s22 + $0x80] sm:$0xff]  ;;  %v1072_v51 = vld [vmem:[%s965_s22 + $0xb8] sm:$0xff]  ;;  %v263_v52 = vmul.f32 %v1056_v43, %v1056_v43  ;;  %p764_p8 = scmp.lt.s32.totalorder %s1185_s14, %s762_s11  ;;  %p765_p10 = scmp.lt.s32.totalorder %s763_s12, %s757_s19 }
  0x40   : > { %v270_v54 = vmul.f32 %v1062_v45, %v1062_v45  ;;  %v1079_v56 = vld [vmem:[%s965_s22 + $0x90] sm:$0xff]  ;;  %v1082_v57 = vld [vmem:[%s965_s22 + $0xc8] sm:$0xff]  ;;  %v265_v58 = vmul.f32 %v1069_v50, %v1069_v50  ;;  %v272_v60 = vmul.f32 %v1072_v51, %v1072_v51  ;;  %v1089_v62 = vld [vmem:[%s965_s22 + $0xa0] sm:$0xff]  ;;  %p760_p13 = pneg %p759_p12 }
  0x41   : > { %v305_v29 = vadd.f32 %v304_v22, %v258_v12  ;;  %v283_v40 = vadd.f32 %v282_v33, %v255_v26  ;;  %v1092_v63 = vld [vmem:[%s965_s22 + $0xd8] sm:$0xff]  ;;  %v267_v0 = vmul.f32 %v1079_v56, %v1079_v56  ;;  %v274_v6 = vmul.f32 %v1082_v57, %v1082_v57  ;;  %v1099_v9 = vld [vmem:[%s965_s22 + $0xb0] sm:$0xff]  ;;  %v1102_v10 = vld [vmem:[%s965_s22 + $0xe8] sm:$0xff]  ;;  %p766_p0 = por %p765_p10, %p764_p8 }
  0x42   : > { %v269_v12 = vmul.f32 %v1089_v62, %v1089_v62  ;;  %v276_v19 = vmul.f32 %v1092_v63, %v1092_v63  ;;  %v1112_v22 = vld [vmem:[%s965_s22 + $0xf8] sm:$0xff]  ;;  %v271_v24 = vmul.f32 %v1099_v9, %v1099_v9  ;;  %v278_v27 = vmul.f32 %v1102_v10, %v1102_v10  ;;  %v1126_v37 = vld [vmem:[%s965_s22 + $0xe0] sm:$0xff] }
  0x43   : > { %v306_v35 = vadd.f32 %v305_v29, %v260_v21  ;;  %v284_v47 = vadd.f32 %v283_v40, %v257_v32  ;;  %386 = vperm.xlu0 %703, %v378_v44   ;;  %v1109_v21 = vld [vmem:[%s965_s22 + $0xc0] sm:$0xff]  ;;  %v1119_v29 = vld [vmem:[%s965_s22 + $0xd0] sm:$0xff]  ;;  %v277_v44 = vmul.f32 %v1126_v37, %v1126_v37  ;;  %p767_p2 = pnand %p766_p0, %p760_p13 }
  0x44   : > { %v273_v32 = vmul.f32 %v1109_v21, %v1109_v21 }
  0x45   : > { %v307_v42 = vadd.f32 %v306_v35, %v262_v28  ;;  %v285_v53 = vadd.f32 %v284_v47, %v259_v39  ;;  %v275_v39 = vmul.f32 %v1119_v29, %v1119_v29 }
  0x47   : > { %v308_v49 = vadd.f32 %v307_v42, %v264_v34  ;;  %v286_v59 = vadd.f32 %v285_v53, %v261_v46  ;;  %v280_v34 = vmul.f32 %v1112_v22, %v1112_v22  ;;  %v1131_v42 = vld [vmem:[%s965_s22 + $0xf0] sm:$0xff] }
  0x49   : > { %v309_v55 = vadd.f32 %v308_v49, %v266_v41  ;;  %v287_v5 = vadd.f32 %v286_v59, %v263_v52 }
  0x4b   : > { %v310_v61 = vadd.f32 %v309_v55, %v268_v48  ;;  %v288_v13 = vadd.f32 %v287_v5, %v265_v58  ;;  %v279_v48 = vmul.f32 %v1131_v42, %v1131_v42 }
  0x4d   : > { %v311_v7 = vadd.f32 %v310_v61, %v270_v54  ;;  %v289_v26 = vadd.f32 %v288_v13, %v267_v0 }
  0x4f   : > { %v312_v20 = vadd.f32 %v311_v7, %v272_v60  ;;  %v290_v33 = vadd.f32 %v289_v26, %v269_v12 }
  0x51   : > { %v313_v28 = vadd.f32 %v312_v20, %v274_v6  ;;  %v291_v40 = vadd.f32 %v290_v33, %v271_v24 }
  0x53   : > { %v314_v35 = vadd.f32 %v313_v28, %v276_v19  ;;  %v292_v46 = vadd.f32 %v291_v40, %v273_v32 }
  0x55   : > { %v315_v41 = vadd.f32 %v314_v35, %v278_v27  ;;  %v293_v49 = vadd.f32 %v292_v46, %v275_v39 }
  0x57   : > { %v316_v47 = vadd.f32 %v315_v41, %v280_v34  ;;  %v294_v53 = vadd.f32 %v293_v49, %v277_v44 }
  0x59   : > { %v317_v52 = vrot.slane %v316_v47, 4  ;;  %v295_v55 = vadd.f32 %v294_v53, %v279_v48 }
  0x5b   : > { %v318_v54 = vadd.f32 %v317_v52, %v316_v47  ;;  %v296_v59 = vrot.slane %v295_v55, 4 }
  0x5d   : > { %v319_v58 = vrot.slane %v318_v54, 2  ;;  %v297_v61 = vadd.f32 %v296_v59, %v295_v55 }
  0x5f   : > { %v320_v60 = vadd.f32 %v319_v58, %v318_v54  ;;  %v298_v5 = vrot.slane %v297_v61, 2 }
  0x61   : > { %v321_v0 = vrot.slane %v320_v60, 1  ;;  %v299_v7 = vadd.f32 %v298_v5, %v297_v61 }
  0x63   : > { %v322_v6 = vadd.f32 %v321_v0, %v320_v60  ;;  %v300_v13 = vrot.slane %v299_v7, 1 }
  0x65   : > { %v324_v12 = vmax.f32 %v322_v6, 1e-24  ;;  %v301_v19 = vadd.f32 %v300_v13, %v299_v7 }
  0x67   : > { %705 = vrsqrt.f32 %v324_v12  ;;  %v323_v20 = vmax.f32 %v301_v19, 1e-24 }
  0x69   : > { %707 = vrsqrt.f32 %v323_v20 }
  0x71   : > { %v706_v24 = vpop.eup %705 }
  0x72   : > { %v328_v26 = vmul.f32 %v706_v24, %v972_v1  ;;  %v330_v27 = vmul.f32 %v706_v24, %v975_v2  ;;  %v332_v32 = vmul.f32 %v706_v24, %v978_v3  ;;  %v334_v33 = vmul.f32 %v706_v24, %v981_v4 }
  0x73   : > { %v708_v34 = vpop.eup %707  ;;  %v336_v1 = vmul.f32 %v706_v24, %v990_v8  ;;  %v338_v2 = vmul.f32 %v706_v24, %v995_v11  ;;  %v348_v53 = vmul.f32 %v706_v24, %v1062_v45  ;;  %v356_v59 = vmul.f32 %v706_v24, %v1102_v10  ;;  %v704_v10 = vld [vmem:[%s1230_s1] sm:$0xff]  }
  0x74   : > { %v360_v28 = vpack.c.bf16 %v330_v27, %v328_v26  ;;  %v327_v35 = vmul.f32 %v708_v34, %v1000_v14  ;;  %v329_v39 = vmul.f32 %v708_v34, %v1003_v15  ;;  %v331_v40 = vmul.f32 %v708_v34, %v1009_v17 }
  0x75   : > { %v333_v41 = vmul.f32 %v708_v34, %v1012_v18  ;;  %v362_v44 = vpack.c.bf16 %v334_v33, %v332_v32  ;;  %v335_v4 = vmul.f32 %v708_v34, %v1021_v23  ;;  %v337_v47 = vmul.f32 %v708_v34, %v1033_v30 }
  0x76   : > { %395 = vmatprep.subr.bf16.mxu0 %v360_v28  ;;  %468 = vmatprep.subr.bf16.mxu1 %v360_v28  ;;  %v359_v46 = vpack.c.bf16 %v329_v39, %v327_v35  ;;  %v364_v14 = vpack.c.bf16 %v338_v2, %v336_v1  ;;  %v340_v15 = vmul.f32 %v706_v24, %v1006_v16 }
  0x77   : > { %v361_v3 = vpack.c.bf16 %v333_v41, %v331_v40  ;;  %v342_v17 = vmul.f32 %v706_v24, %v1026_v25  ;;  %v363_v18 = vpack.c.bf16 %v337_v47, %v335_v4  ;;  %v339_v8 = vmul.f32 %v708_v34, %v1043_v36 }
  0x78   : > { %396 = vmatpush1.bf16.msra.mxu0 %v359_v46  ;;  %469 = vmatpush1.bf16.xpose.msra.mxu1 %v359_v46  ;;  %v341_v11 = vmul.f32 %v708_v34, %v1056_v43  ;;  %v344_v23 = vmul.f32 %v706_v24, %v1036_v31  ;;  %v346_v30 = vmul.f32 %v706_v24, %v1049_v38 }
  0x79   : > { %397 = vmatprep.subr.bf16.mxu0 %v362_v44  ;;  %470 = vmatprep.subr.bf16.mxu1 %v362_v44  ;;  %v366_v48 = vpack.c.bf16 %v342_v17, %v340_v15  ;;  %v343_v16 = vmul.f32 %v708_v34, %v1069_v50  ;;  %v345_v25 = vmul.f32 %v708_v34, %v1079_v56 }
  0x7a   : > { %v365_v49 = vpack.c.bf16 %v341_v11, %v339_v8  ;;  %v368_v52 = vpack.c.bf16 %v346_v30, %v344_v23  ;;  %v350_v36 = vmul.f32 %v706_v24, %v1072_v51  ;;  %v347_v31 = vmul.f32 %v708_v34, %v1089_v62 }
  0x7b   : > { %v367_v43 = vpack.c.bf16 %v345_v25, %v343_v16  ;;  %v349_v38 = vmul.f32 %v708_v34, %v1099_v9  ;;  %v352_v50 = vmul.f32 %v706_v24, %v1082_v57  ;;  %v354_v56 = vmul.f32 %v706_v24, %v1092_v63 }
  0x7c   : > { %398 = vmatpush1.bf16.msra.mxu0 %v361_v3  ;;  %v370_v54 = vpack.c.bf16 %v350_v36, %v348_v53  ;;  %v351_v45 = vmul.f32 %v708_v34, %v1109_v21  ;;  %v353_v51 = vmul.f32 %v708_v34, %v1119_v29  ;;  %v358_v62 = vmul.f32 %v706_v24, %v1112_v22  ;;  %v516_v53 = vld [vmem:[%s1231_s2 + $0x8] sm:$0xff] }
  0x7d   : > { %399 = vmatprep.subr.bf16.mxu0 %v364_v14  ;;  %v369_v55 = vpack.c.bf16 %v349_v38, %v347_v31  ;;  %v372_v58 = vpack.c.bf16 %v354_v56, %v352_v50  ;;  %v355_v57 = vmul.f32 %v708_v34, %v1126_v37  ;;  %v357_v63 = vmul.f32 %v708_v34, %v1131_v42 }
  0x7e   : > { %v371_v9 = vpack.c.bf16 %v353_v51, %v351_v45  ;;  %v374_v60 = vpack.c.bf16 %v358_v62, %v356_v59 }
  0x7f   : > { %v373_v21 = vpack.c.bf16 %v357_v63, %v355_v57 }
  0x80   : > { %400 = vmatpush1.bf16.msra.mxu0 %v363_v18  ;;  %471 = vmatpush1.bf16.xpose.msra.mxu1 %v361_v3 }
  0x81   : > { %401 = vmatprep.subr.bf16.mxu0 %v366_v48  ;;  %472 = vmatprep.subr.bf16.mxu1 %v364_v14 }
  0x84   : > { %402 = vmatpush1.bf16.msra.mxu0 %v365_v49 }
  0x85   : > { %403 = vmatprep.subr.bf16.mxu0 %v368_v52 }
  0x88   : > { %404 = vmatpush1.bf16.msra.mxu0 %v367_v43  ;;  %473 = vmatpush1.bf16.xpose.msra.mxu1 %v363_v18 }
  0x89   : > { %405 = vmatprep.subr.bf16.mxu0 %v370_v54  ;;  %474 = vmatprep.subr.bf16.mxu1 %v366_v48 }
  0x8c   : > { %406 = vmatpush1.bf16.msra.mxu0 %v369_v55 }
  0x8d   : > { %407 = vmatprep.subr.bf16.mxu0 %v372_v58 }
  0x90   : > { %408 = vmatpush1.bf16.msra.mxu0 %v371_v9  ;;  %475 = vmatpush1.bf16.xpose.msra.mxu1 %v365_v49 }
  0x91   : > { %409 = vmatprep.subr.bf16.mxu0 %v374_v60  ;;  %476 = vmatprep.subr.bf16.mxu1 %v368_v52  ;;  %v515_v52 = vld [vmem:[%s1231_s2] sm:$0xff] }
  0x94   : > { %410 = vmatpush1.bf16.msra.mxu0 %v373_v21 }
  0x97   : > { %428 = vmatmul.mubr.bf16.vlgmr.msra.gmra.mrb[0].mxu0 %v704_v10 }
  0x98   : > { %477 = vmatpush1.bf16.xpose.msra.mxu1 %v367_v43 }
  0x99   : > { %478 = vmatprep.subr.bf16.mxu1 %v370_v54 }
  0xa0   : > { %479 = vmatpush1.bf16.xpose.msra.mxu1 %v369_v55 }
  0xa1   : > { %480 = vmatprep.subr.bf16.mxu1 %v372_v58 }
  0xa8   : > { %481 = vmatpush1.bf16.xpose.msra.mxu1 %v371_v9 }
  0xa9   : > { %482 = vmatprep.subr.bf16.mxu1 %v374_v60 }
  0xb0   : > { %483 = vmatpush1.bf16.xpose.msra.mxu1 %v373_v21 }
  0xbe   : > { %v382_v22 = vpop.permute.xlu0 %381 }
  0xc2   : > { %v387_v61 = vpop.permute.xlu0 %386 }
 0x16a   : > { %v429_v29 = vpop.f32.mrb[0].mxu0 }
 0x16b   : > { %v430_v37 = vadd.f32 %v429_v29, %v382_v22  ;;  %v431_v42 = vpop.f32.mrb[1].mxu0 }
 0x16c   : > { %v432_v0 = vadd.f32 %v431_v42, %v382_v22  ;;  %v433_v5 = vpop.f32.mrb[2].mxu0 }
 0x16d   : > { %v438_v6 = vmul.f32 1.442695, %v430_v37  ;;  %v434_v7 = vadd.f32 %v433_v5, %v387_v61  ;;  %v435_v12 = vpop.f32.mrb[3].mxu0 }
 0x16e   : > { %v440_v13 = vmul.f32 1.442695, %v432_v0  ;;  %v436_v19 = vadd.f32 %v435_v12, %v387_v61 }
 0x16f   : > { %709 = vpow2.f32 %v438_v6  ;;  %v442_v20 = vmul.f32 1.442695, %v434_v7 }
 0x170   : > { %711 = vpow2.f32 %v440_v13  ;;  %v444_v24 = vmul.f32 1.442695, %v436_v19 }
 0x171   : > { %713 = vpow2.f32 %v442_v20 }
 0x172   : > { %715 = vpow2.f32 %v444_v24 }
 0x179   : > { %v710_v26 = vpop.eup %709 }
 0x17a   : > { %v712_v27 = vpop.eup %711 }
 0x17b   : > { %v714_v28 = vpop.eup %713 }
 0x17c   : > { %v716_v32 = vpop.eup %715  ;;  %v446_v33 = vadd.f32 %v714_v28, %v710_v26 }
 0x17d   : > { %v453_v34 = vadd.f32 %v716_v32, %v712_v27 }
 0x17e   : > { %v447_v35 = vrot.slane %v446_v33, 4 }
 0x17f   : > { %v454_v39 = vrot.slane %v453_v34, 4 }
 0x180   : > { %v448_v40 = vadd.f32 %v447_v35, %v446_v33 }
 0x181   : > { %v455_v41 = vadd.f32 %v454_v39, %v453_v34 }
 0x182   : > { %v449_v44 = vrot.slane %v448_v40, 2 }
 0x183   : > { %v456_v1 = vrot.slane %v455_v41, 2 }
 0x184   : > { %v450_v2 = vadd.f32 %v449_v44, %v448_v40 }
 0x185   : > { %v457_v46 = vadd.f32 %v456_v1, %v455_v41 }
 0x186   : > { %v451_v3 = vrot.slane %v450_v2, 1 }
 0x187   : > { %v458_v4 = vrot.slane %v457_v46, 1 }
 0x188   : > { %v452_v47 = vadd.f32 %v451_v3, %v450_v2 }
 0x189   : > { %v459_v14 = vadd.f32 %v458_v4, %v457_v46 }
 0x18a   : > { %717 = vrcp.f32 %v452_v47 }
 0x18b   : > { %719 = vrcp.f32 %v459_v14 }
 0x194   : > { %v718_v15 = vpop.eup %717 }
 0x195   : > { %v720_v17 = vpop.eup %719  ;;  %v461_v18 = vmul.f32 %v718_v15, %v710_v26  ;;  %v464_v8 = vmul.f32 %v718_v15, %v714_v28 }
 0x196   : > { %v463_v11 = vmul.f32 %v720_v17, %v712_v27  ;;  %v465_v48 = vmul.f32 %v720_v17, %v716_v32 }
 0x197   : > { %v466_v23 = vpack.c.bf16 %v464_v8, %v461_v18 }
 0x198   : > { %v467_v30 = vpack.c.bf16 %v465_v48, %v463_v11  ;;  %v509_v49 = vadd.f32 %v463_v11, %v461_v18  ;;  %v512_v16 = vadd.f32 %v465_v48, %v464_v8 }
 0x19a   : > { %500 = vmatprep.mubr.bf16.mxu1 %v467_v30  ;;  %510 = vadd.xlane.f32.xlu1 %v509_v49 }
 0x19b   : > { %501 = vmatmul.mubr.bf16.vlgmr.msra.gmra.mrb[0].mxu1 %v466_v23 }
 0x19e   : > { %513 = vadd.xlane.f32.xlu1 %v512_v16 }
 0x227   : > { %v511_v25 = vpop.xlane.xlu1 %510 }
 0x228   : > { %v517_v43 = vmul.f32 %v515_v52, %v511_v25 }
 0x22b   : > { %v514_v36 = vpop.xlane.xlu1 %513 }
 0x22c   : > { %v518_v38 = vmul.f32 %v516_v53, %v514_v36 }
 0x26e   : > { %v502_v31 = vpop.f32.mrb[0].mxu1 }
 0x26f   : > { %v519_v54 = vsub.f32 %v502_v31, %v517_v43  ;;  %v504_v50 = vpop.f32.mrb[1].mxu1 }
 0x270   : > { %v505_v56 = vpop.f32.mrb[2].mxu1 }
 0x271   : > { %v520_v55 = vsub.f32 %v505_v56, %v518_v38  ;;  %v507_v45 = vpop.f32.mrb[3].mxu1  ;;  %v521_v51 = vmul.f32 %v519_v54, %v519_v54 }
 0x273   : > { %v522_v58 = vmul.f32 %v520_v55, %v520_v55 }
 0x275   : > { %v523_v59 = vadd.f32 %v522_v58, %v521_v51 }
 0x277   : > { %v524_v62 = vrot.slane %v523_v59, 4 }
 0x279   : > { %v525_v9 = vadd.f32 %v524_v62, %v523_v59 }
 0x27b   : > { %v526_v57 = vrot.slane %v525_v9, 2 }
 0x27d   : > { %v527_v63 = vadd.f32 %v526_v57, %v525_v9 }
 0x27f   : > { %v528_v60 = vrot.slane %v527_v63, 1 }
 0x281   : > { %v529_v21 = vadd.f32 %v528_v60, %v527_v63 }
 0x283   : > { %v530_v10 = vmax.f32 %v529_v21, 1e-24 }
 0x285   : > { %721 = vrsqrt.f32 %v530_v10 }
 0x28f   : > { %v722_v22 = vpop.eup %721 }
 0x290   : > { %v533_v29 = vmul.f32 %v722_v22, %v520_v55  ;;  %v532_v37 = vmul.f32 %v722_v22, %v519_v54 }
 0x292   : > { %v535_v42 = vmul.f32 %v533_v29, %v533_v29  ;;  %v534_v61 = vmul.f32 %v532_v37, %v532_v37 }
 0x294   : > { %538 = vadd.xlane.f32.xlu1 %v535_v42  ;;  %536 = vadd.xlane.f32.xlu0 %v534_v61 }
 0x321   : > { %v539_v0 = vpop.xlane.xlu1 %538  ;;  %v537_v5 = vpop.xlane.xlu0 %536 }
 0x322   : > { %v541_v6 = vmax.f32 %v539_v0, 1e-24  ;;  %v540_v7 = vmax.f32 %v537_v5, 1e-24 }
 0x324   : > { %723 = vrsqrt.f32 %v541_v6 }
 0x325   : > { %725 = vrsqrt.f32 %v540_v7 }
 0x32e   : > { %v724_v12 = vpop.eup %723 }
 0x32f   : > { %v726_v13 = vpop.eup %725  ;;  %v545_v19 = vmul.f32 %v724_v12, %v533_v29 }
 0x330   : > { %v544_v20 = vmul.f32 %v726_v13, %v532_v37 }
 0x331   : > { %547 = vst [vmem:[%s215_s9 + $0x8] sm:$0xff] %v545_v19 }
 0x332   : > { %546 = vst [vmem:[%s215_s9] sm:$0xff] %v544_v20 }
 0x333   : > { %770 = shalt.err (!%p767_p2)
}
 0x334   : > { %s771_s23 = scalar_lea.hbm %s1183_s26, 256  ;;  %s775_s30 = scalar_lea.hbm %s1233_s4, 512 }
 0x335   : > { %p772_p4 = scmp.ne.s32.totalorder %s1183_s26, %s771_s23  ;;  %p776_p9 = scmp.lt.u32.totalorder %s1183_s26, %s1233_s4 }
 0x336   : > { %p777_p1 = scmp.lt.u32.totalorder %s775_s30, %s771_s23  ;;  %p779_p6 = scmp.lt.u32.totalorder %s771_s23, %s1183_s26 }
 0x337   : > { %p773_p5 = pnand %p772_p4, %p1240_p11 }
 0x338   : > { %p778_p3 = por %p777_p1, %p776_p9 }
 0x339   : > { %p774_p7 = pneg %p773_p5 }
 0x33a   : > { %p780_p12 = por %p779_p6, %p778_p3 }
 0x33c   : > { %p781_p13 = pnand %p780_p12, %p774_p7 }
 0x33e   : > { %784 = shalt.err (!%p781_p13)
}
 0x33f   : > { %s830_s7 = smov 128   ;;  %s831_s9 = smov 8  }
 0x340   : > { %654 = dma.vmem_to_hbm [thread:$0]  (%p1240_p11), %s1185_s14, 256, %s1183_s26, %s549_s8, %s830_s7, %s830_s7, %s831_s9  }
 0x341 PF: > { %s577_s20 = sand.u32 1, %s811_s15   ;;  %p1241_p8 = scmp.ne.s32.totalorder %s1238_s28, 0 }
 0x342   : > { %p1242_p10 = scmp.ge.s32.totalorder %s823_s18, 2  ;;  %s578_s22 = scalar_lea.sflag [#allocation4], %s577_s20 }
 0x344   : > { %p661_p0 = pnand %p1242_p10, %p1241_p8 }
 0x346   : > { %806 = dma.done.wait (!%p661_p0), %s578_s22, 256  }
 0x347   : > { %808 = vsyncadd (!%p661_p0), %s578_s22, 4294967040  ;;  %p17_p2 = scmp.ge.s32.totalorder %s882_s21, 4   ;;  %s1243_s15 = smov %s815_s16 }
 0x348   : > { %s1244_s16 = smov %s819_s17  ;;  %s1245_s17 = smov %s894_s24 }
 0x349   : > { %s1246_s18 = smov %s882_s21  ;;  %19 = sbr.rel (!%p17_p2) target bundleno = 5 (0x5), region = 81 }
 0x350   :  { %583 = vsyncpa [#allocation3], 1 }
 0x351   :  { %585 = vsyncpa [#allocation3 + $0x1], 1 }
 0x352   :  { %586 = vsyncpa [#allocation4], 1 }
 0x353   :  { %588 = vsyncpa [#allocation4 + $0x1], 1 }

</bundles_post_ra>
